<compile_context>
chip_gen: v5e
topology: v5e:2x2
jax: 0.10.0
libtpu: 0.0.40
codegen_flags: <defaults>
</compile_context>

<pallas_src>
import jax
import jax.numpy as jnp
import numpy as np
from jax.experimental import pallas as pl
from jax.experimental.pallas import tpu as pltpu

ALPHA = 0.0  # FISM alpha (matches the module default)


def _vmem_capacity_bytes():
    """Physical VMEM per TensorCore (64 MiB on v7x, 128 MiB on v5e/v6e)."""
    try:
        info = pltpu.get_tpu_info()
        cap = int(getattr(info, "vmem_capacity_bytes", 128 * 1024 * 1024))
        if cap <= 0:
            cap = 128 * 1024 * 1024
    except Exception:  # pragma: no cover - conservative fallback off-TPU
        cap = 128 * 1024 * 1024
    return cap


def _tile_footprint_bytes(tb, max_deg, ns, dim):
    """Double-buffered per-grid-step VMEM footprint of all operands."""
    emb = 2  # bf16 embeddings
    per_step = (max_deg * tb * dim * emb   # p_nbr plane stack
                + tb * dim * emb           # p_self
                + ns * tb * dim * emb      # q_all plane stack
                + tb * ns * 4              # bias (f32)
                + tb * 4                   # ndeg (f32)
                + tb * ns * 4)             # output (f32)
    return 2 * per_step                    # BlockSpec double buffering


def _pick_batch_tile(batch, max_deg, ns, dim, budget_bytes, min_steps=2):
    """Largest multiple-of-8 divisor of B whose working set fits the VMEM
    budget; prefer >= min_steps grid steps so v7x's two TCs both get work."""
    cands = [t for t in range(8, min(batch, 2048) + 1, 8) if batch % t == 0]
    cands.sort(reverse=True)
    for require_steps in (True, False):
        for tb in cands:
            if require_steps and batch // tb < min_steps:
                continue
            if _tile_footprint_bytes(tb, max_deg, ns, dim) <= budget_bytes:
                return tb
    return batch  # no multiple-of-8 divisor: take the whole batch (grid=(1,))


def _make_fism_kernel(max_deg, ns, alpha):
    use_scale = (alpha != 0.0)

    def kernel(p_nbr_ref, p_self_ref, q_all_ref, bias_ref, *rest):
        if use_scale:
            ndeg_ref, out_ref = rest
        else:
            (out_ref,) = rest

        # --- neighbor segment-sum (padded slots are exact-zero rows) -------
        # Layout (MAX_DEG, TB, D): each addend is a clean (TB, D) tile.
        # 4 partial accumulators + pairwise combine expose VALU ILP instead
        # of one serial add chain; accumulation in f32.
        n_acc = min(4, max_deg)
        accs = [p_nbr_ref[j].astype(jnp.float32) for j in range(n_acc)]
        for j in range(n_acc, max_deg):
            accs[j % n_acc] = accs[j % n_acc] + p_nbr_ref[j].astype(jnp.float32)
        while len(accs) > 1:
            accs = [accs[i] + accs[i + 1] if i + 1 < len(accs) else accs[i]
                    for i in range(0, len(accs), 2)]
        p_sum = accs[0]

        p_ctx = p_sum - p_self_ref[...].astype(jnp.float32)          # (TB, D)

        # --- fused positive + negative scoring -----------------------------
        # q_all is plane-major (NS, TB, D); loop over the NS (~1+N_NEG)
        # planes so every multiply/reduce stays on a (TB, D) tile and no
        # (TB, NS, D) broadcast intermediate ever materializes.
        cols = []
        for s in range(ns):
            q_s = q_all_ref[s].astype(jnp.float32)                   # (TB, D)
            cols.append(jnp.sum(p_ctx * q_s, axis=-1, keepdims=True))  # (TB, 1)
        pq = jnp.concatenate(cols, axis=-1)                          # (TB, NS)

        if use_scale:
            ndeg = ndeg_ref[...]                                     # (TB, 1), clamped >= 1
            if alpha == 1.0:
                scale = 1.0 / ndeg                                   # exact divide
            else:
                scale = ndeg ** jnp.float32(-alpha)
            pq = pq * scale

        out_ref[...] = bias_ref[...] + pq

    return kernel


def fism_forward(p_nbr_t, p_self, q, q_neg, bu, bi, bi_neg, ndeg=None,
                 alpha=ALPHA):
    """FISM scoring.

    p_nbr_t : (MAX_DEG, B, D)  P(I_U), neighbor-major; padded slots are zeros
    p_self  : (B, D)           P(I)
    q       : (B, D)           Q(I)
    q_neg   : (B, N_NEG, D)    Q(I_neg)
    bu, bi  : (B,)             b_u[U], b_i[I]
    bi_neg  : (B, N_NEG)       b_i[I_neg]
    ndeg    : (B,)             N_U as float (only used when alpha != 0)
    returns : r (B,), r_neg (B, N_NEG)
    """
    max_deg, batch, dim = p_nbr_t.shape
    n_neg = q_neg.shape[1]
    ns = 1 + n_neg

    # bf16 inputs halve HBM traffic (kernel is bandwidth bound); f32 accum
    # inside the kernel.  This is an intentional numerics choice.
    emb_dt = jnp.bfloat16
    p_nbr_t = p_nbr_t.astype(emb_dt)
    p_self = p_self.astype(emb_dt)
    # Plane-major q stack: (NS, B, D) = [q ; q_neg planes]
    q_all_t = jnp.concatenate(
        [q[None, :, :], jnp.swapaxes(q_neg, 0, 1)], axis=0).astype(emb_dt)

    # Fold every per-row bias into one lane-packed (B, NS) array.
    bias_all = (bu[:, None]
                + jnp.concatenate([bi[:, None], bi_neg], axis=1)).astype(jnp.float32)

    use_scale = (alpha != 0.0)

    # Generation-aware VMEM budgeting: ~55% of physical VMEM for the
    # double-buffered working set, ~80% as the scoped limit.
    vmem_cap = _vmem_capacity_bytes()
    tile_budget = int(vmem_cap * 0.55)
    vmem_limit = int(vmem_cap * 0.80)

    tb = _pick_batch_tile(batch, max_deg, ns, dim, tile_budget)
    grid = (batch // tb,)

    in_specs = [
        pl.BlockSpec((max_deg, tb, dim), lambda i: (0, i, 0)),   # p_nbr_t
        pl.BlockSpec((tb, dim), lambda i: (i, 0)),               # p_self
        pl.BlockSpec((ns, tb, dim), lambda i: (0, i, 0)),        # q_all_t
        pl.BlockSpec((tb, ns), lambda i: (i, 0)),                # bias_all
    ]
    inputs = [p_nbr_t, p_self, q_all_t, bias_all]
    if use_scale:
        in_specs.append(pl.BlockSpec((tb, 1), lambda i: (i, 0)))
        # clamp so degree-0 users can't yield inf/NaN in the power
        inputs.append(jnp.maximum(ndeg.astype(jnp.float32), 1.0)[:, None])

    out = pl.pallas_call(
        _make_fism_kernel(max_deg, ns, alpha),
        out_shape=jax.ShapeDtypeStruct((batch, ns), jnp.float32),
        grid=grid,
        in_specs=in_specs,
        out_specs=pl.BlockSpec((tb, ns), lambda i: (i, 0)),
        compiler_params=pltpu.CompilerParams(
            dimension_semantics=("parallel",),        # megacore-shard on v7x
            vmem_limit_bytes=vmem_limit,
        ),
    )(*inputs)

    return out[:, 0], out[:, 1:]


if __name__ == "__main__":
    key = jax.random.PRNGKey(0)
    k1, k2, k3, k4, k5, k6, k7 = jax.random.split(key, 7)

    NUM_USERS, NUM_MOVIES, D = 32, 64, 32
    B, MAX_DEG, N_NEG = 8, 8, 8

    # TODO(synk): the PinSAGE submodules P/Q and the DGL heterograph have no
    # Pallas equivalent; they are replaced by deterministic embedding tables
    # of their outputs and a padded fixed-width neighbor table.
    P_table = jax.random.normal(k1, (NUM_MOVIES, D), jnp.float32) * 0.1
    Q_table = jax.random.normal(k2, (NUM_MOVIES, D), jnp.float32) * 0.1

    # FISM parameters, as in __init__ (zeros)
    b_u = jnp.zeros((NUM_USERS,), jnp.float32)
    b_i = jnp.zeros((NUM_MOVIES,), jnp.float32)

    # Synthetic heterograph: per-user degree + padded neighbor (movie) lists
    degs = jax.random.randint(k3, (NUM_USERS,), 1, MAX_DEG + 1)
    nbr_table = jax.random.randint(k4, (NUM_USERS, MAX_DEG), 0, NUM_MOVIES)

    # Batch inputs I, U, I_neg
    U = jax.random.randint(k5, (B,), 0, NUM_USERS)
    I = jax.random.randint(k6, (B,), 0, NUM_MOVIES)
    I_neg = jax.random.randint(k7, (B, N_NEG), 0, NUM_MOVIES)

    # Glue (plain JAX): graph lookups + embedding gathers.  The padding mask
    # is folded into the gather by pointing padded slots at an appended
    # all-zero embedding row, and the gather is done neighbor-major so the
    # kernel sees (MAX_DEG, B, D) directly (no extra transpose op).
    N_U = degs[U]                                               # (B,)
    nbr = nbr_table[U]                                          # (B, MAX_DEG)
    valid = jnp.arange(MAX_DEG)[None, :] < N_U[:, None]
    nbr_pad = jnp.where(valid, nbr, NUM_MOVIES)                 # padded -> zero row
    P_pad = jnp.concatenate([P_table, jnp.zeros((1, D), jnp.float32)], axis=0)

    p_nbr_t = P_pad[nbr_pad.T]                                  # (MAX_DEG, B, D)
    p_self = P_table[I]                                         # (B, D)
    q = Q_table[I]                                              # (B, D)
    q_neg = Q_table[I_neg]                                      # (B, N_NEG, D)
    bu = b_u[U]                                                 # (B,)
    bi = b_i[I]                                                 # (B,)
    bi_neg = b_i[I_neg]                                         # (B, N_NEG)

    r, r_neg = fism_forward(p_nbr_t, p_self, q, q_neg, bu, bi, bi_neg,
                            ndeg=N_U.astype(jnp.float32), alpha=ALPHA)
    jax.block_until_ready((r, r_neg))

    # Pure-JAX reference (mirrors the PyTorch forward, using the same
    # bf16-rounded embeddings the kernel consumes — documented choice).
    f32 = jnp.float32
    bf = lambda x: x.astype(jnp.bfloat16).astype(f32)
    p_sum_ref = jnp.sum(bf(p_nbr_t), axis=0)                    # (B, D)
    p_ctx_ref = p_sum_ref - bf(p_self)
    nuf = jnp.maximum(N_U.astype(f32), 1.0)
    pq_ref = jnp.sum(p_ctx_ref * bf(q), axis=1) / nuf ** ALPHA
    r_ref = b_u[U] + b_i[I] + pq_ref
    pq_neg_ref = jnp.sum(p_ctx_ref[:, None, :] * bf(q_neg), axis=2) / nuf[:, None] ** ALPHA
    r_neg_ref = b_u[U][:, None] + b_i[I_neg] + pq_neg_ref

    assert np.allclose(np.asarray(r), np.asarray(r_ref), atol=1e-4, rtol=1e-4)
    assert np.allclose(np.asarray(r_neg), np.asarray(r_neg_ref), atol=1e-4, rtol=1e-4)
    print("KERNEL_OK")
</pallas_src>

<mosaic_0001>
module attributes {stable_mosaic.version = 11 : i64} {
  func.func @kernel(%arg0: i32, %arg1: memref<8x8x32xbf16, #tpu.memory_space<vmem>>, %arg2: memref<8x32xbf16, #tpu.memory_space<vmem>>, %arg3: memref<9x8x32xbf16, #tpu.memory_space<vmem>>, %arg4: memref<8x9xf32, #tpu.memory_space<vmem>>, %arg5: memref<8x9xf32, #tpu.memory_space<vmem>>) attributes {dimension_semantics = [#tpu.dimension_semantics<parallel>], iteration_bounds = array<i64: 1>, scalar_prefetch = 0 : i64, scratch_operands = 0 : i64, tpu.core_type = #tpu.core_type<tc>, window_params = [{transform_indices = @transform_0, window_bounds = array<i64: 8, 8, 32>}, {transform_indices = @transform_1, window_bounds = array<i64: 8, 32>}, {transform_indices = @transform_2, window_bounds = array<i64: 9, 8, 32>}, {transform_indices = @transform_3, window_bounds = array<i64: 8, 9>}, {transform_indices = @transform_4, window_bounds = array<i64: 8, 9>}]} {
    %c0 = arith.constant 0 : index
    %c0_0 = arith.constant 0 : index
    %c0_1 = arith.constant 0 : index
    %0 = vector.load %arg1[%c0, %c0_0, %c0_1] : memref<8x8x32xbf16, #tpu.memory_space<vmem>>, vector<1x8x32xbf16>
    %1 = vector.shape_cast %0 : vector<1x8x32xbf16> to vector<8x32xbf16>
    %2 = arith.extf %1 : vector<8x32xbf16> to vector<8x32xf32>
    %c1 = arith.constant 1 : index
    %c0_2 = arith.constant 0 : index
    %c0_3 = arith.constant 0 : index
    %3 = vector.load %arg1[%c1, %c0_2, %c0_3] : memref<8x8x32xbf16, #tpu.memory_space<vmem>>, vector<1x8x32xbf16>
    %4 = vector.shape_cast %3 : vector<1x8x32xbf16> to vector<8x32xbf16>
    %5 = arith.extf %4 : vector<8x32xbf16> to vector<8x32xf32>
    %c2 = arith.constant 2 : index
    %c0_4 = arith.constant 0 : index
    %c0_5 = arith.constant 0 : index
    %6 = vector.load %arg1[%c2, %c0_4, %c0_5] : memref<8x8x32xbf16, #tpu.memory_space<vmem>>, vector<1x8x32xbf16>
    %7 = vector.shape_cast %6 : vector<1x8x32xbf16> to vector<8x32xbf16>
    %8 = arith.extf %7 : vector<8x32xbf16> to vector<8x32xf32>
    %c3 = arith.constant 3 : index
    %c0_6 = arith.constant 0 : index
    %c0_7 = arith.constant 0 : index
    %9 = vector.load %arg1[%c3, %c0_6, %c0_7] : memref<8x8x32xbf16, #tpu.memory_space<vmem>>, vector<1x8x32xbf16>
    %10 = vector.shape_cast %9 : vector<1x8x32xbf16> to vector<8x32xbf16>
    %11 = arith.extf %10 : vector<8x32xbf16> to vector<8x32xf32>
    %c4 = arith.constant 4 : index
    %c0_8 = arith.constant 0 : index
    %c0_9 = arith.constant 0 : index
    %12 = vector.load %arg1[%c4, %c0_8, %c0_9] : memref<8x8x32xbf16, #tpu.memory_space<vmem>>, vector<1x8x32xbf16>
    %13 = vector.shape_cast %12 : vector<1x8x32xbf16> to vector<8x32xbf16>
    %14 = arith.extf %13 : vector<8x32xbf16> to vector<8x32xf32>
    %15 = arith.addf %2, %14 : vector<8x32xf32>
    %c5 = arith.constant 5 : index
    %c0_10 = arith.constant 0 : index
    %c0_11 = arith.constant 0 : index
    %16 = vector.load %arg1[%c5, %c0_10, %c0_11] : memref<8x8x32xbf16, #tpu.memory_space<vmem>>, vector<1x8x32xbf16>
    %17 = vector.shape_cast %16 : vector<1x8x32xbf16> to vector<8x32xbf16>
    %18 = arith.extf %17 : vector<8x32xbf16> to vector<8x32xf32>
    %19 = arith.addf %5, %18 : vector<8x32xf32>
    %c6 = arith.constant 6 : index
    %c0_12 = arith.constant 0 : index
    %c0_13 = arith.constant 0 : index
    %20 = vector.load %arg1[%c6, %c0_12, %c0_13] : memref<8x8x32xbf16, #tpu.memory_space<vmem>>, vector<1x8x32xbf16>
    %21 = vector.shape_cast %20 : vector<1x8x32xbf16> to vector<8x32xbf16>
    %22 = arith.extf %21 : vector<8x32xbf16> to vector<8x32xf32>
    %23 = arith.addf %8, %22 : vector<8x32xf32>
    %c7 = arith.constant 7 : index
    %c0_14 = arith.constant 0 : index
    %c0_15 = arith.constant 0 : index
    %24 = vector.load %arg1[%c7, %c0_14, %c0_15] : memref<8x8x32xbf16, #tpu.memory_space<vmem>>, vector<1x8x32xbf16>
    %25 = vector.shape_cast %24 : vector<1x8x32xbf16> to vector<8x32xbf16>
    %26 = arith.extf %25 : vector<8x32xbf16> to vector<8x32xf32>
    %27 = arith.addf %11, %26 : vector<8x32xf32>
    %28 = arith.addf %15, %19 : vector<8x32xf32>
    %29 = arith.addf %23, %27 : vector<8x32xf32>
    %30 = arith.addf %28, %29 : vector<8x32xf32>
    %c0_16 = arith.constant 0 : index
    %c0_17 = arith.constant 0 : index
    %31 = vector.load %arg2[%c0_16, %c0_17] : memref<8x32xbf16, #tpu.memory_space<vmem>>, vector<8x32xbf16>
    %32 = arith.extf %31 : vector<8x32xbf16> to vector<8x32xf32>
    %33 = arith.subf %30, %32 : vector<8x32xf32>
    %c0_18 = arith.constant 0 : index
    %c0_19 = arith.constant 0 : index
    %c0_20 = arith.constant 0 : index
    %34 = vector.load %arg3[%c0_18, %c0_19, %c0_20] : memref<9x8x32xbf16, #tpu.memory_space<vmem>>, vector<1x8x32xbf16>
    %35 = vector.shape_cast %34 : vector<1x8x32xbf16> to vector<8x32xbf16>
    %36 = arith.extf %35 : vector<8x32xbf16> to vector<8x32xf32>
    %37 = arith.mulf %33, %36 : vector<8x32xf32>
    %cst = arith.constant dense<0.000000e+00> : vector<8xf32>
    %38 = vector.multi_reduction <add>, %37, %cst [1] : vector<8x32xf32> to vector<8xf32>
    %39 = vector.shape_cast %38 : vector<8xf32> to vector<8x1xf32>
    %c1_21 = arith.constant 1 : index
    %c0_22 = arith.constant 0 : index
    %c0_23 = arith.constant 0 : index
    %40 = vector.load %arg3[%c1_21, %c0_22, %c0_23] : memref<9x8x32xbf16, #tpu.memory_space<vmem>>, vector<1x8x32xbf16>
    %41 = vector.shape_cast %40 : vector<1x8x32xbf16> to vector<8x32xbf16>
    %42 = arith.extf %41 : vector<8x32xbf16> to vector<8x32xf32>
    %43 = arith.mulf %33, %42 : vector<8x32xf32>
    %cst_24 = arith.constant dense<0.000000e+00> : vector<8xf32>
    %44 = vector.multi_reduction <add>, %43, %cst_24 [1] : vector<8x32xf32> to vector<8xf32>
    %45 = vector.shape_cast %44 : vector<8xf32> to vector<8x1xf32>
    %c2_25 = arith.constant 2 : index
    %c0_26 = arith.constant 0 : index
    %c0_27 = arith.constant 0 : index
    %46 = vector.load %arg3[%c2_25, %c0_26, %c0_27] : memref<9x8x32xbf16, #tpu.memory_space<vmem>>, vector<1x8x32xbf16>
    %47 = vector.shape_cast %46 : vector<1x8x32xbf16> to vector<8x32xbf16>
    %48 = arith.extf %47 : vector<8x32xbf16> to vector<8x32xf32>
    %49 = arith.mulf %33, %48 : vector<8x32xf32>
    %cst_28 = arith.constant dense<0.000000e+00> : vector<8xf32>
    %50 = vector.multi_reduction <add>, %49, %cst_28 [1] : vector<8x32xf32> to vector<8xf32>
    %51 = vector.shape_cast %50 : vector<8xf32> to vector<8x1xf32>
    %c3_29 = arith.constant 3 : index
    %c0_30 = arith.constant 0 : index
    %c0_31 = arith.constant 0 : index
    %52 = vector.load %arg3[%c3_29, %c0_30, %c0_31] : memref<9x8x32xbf16, #tpu.memory_space<vmem>>, vector<1x8x32xbf16>
    %53 = vector.shape_cast %52 : vector<1x8x32xbf16> to vector<8x32xbf16>
    %54 = arith.extf %53 : vector<8x32xbf16> to vector<8x32xf32>
    %55 = arith.mulf %33, %54 : vector<8x32xf32>
    %cst_32 = arith.constant dense<0.000000e+00> : vector<8xf32>
    %56 = vector.multi_reduction <add>, %55, %cst_32 [1] : vector<8x32xf32> to vector<8xf32>
    %57 = vector.shape_cast %56 : vector<8xf32> to vector<8x1xf32>
    %c4_33 = arith.constant 4 : index
    %c0_34 = arith.constant 0 : index
    %c0_35 = arith.constant 0 : index
    %58 = vector.load %arg3[%c4_33, %c0_34, %c0_35] : memref<9x8x32xbf16, #tpu.memory_space<vmem>>, vector<1x8x32xbf16>
    %59 = vector.shape_cast %58 : vector<1x8x32xbf16> to vector<8x32xbf16>
    %60 = arith.extf %59 : vector<8x32xbf16> to vector<8x32xf32>
    %61 = arith.mulf %33, %60 : vector<8x32xf32>
    %cst_36 = arith.constant dense<0.000000e+00> : vector<8xf32>
    %62 = vector.multi_reduction <add>, %61, %cst_36 [1] : vector<8x32xf32> to vector<8xf32>
    %63 = vector.shape_cast %62 : vector<8xf32> to vector<8x1xf32>
    %c5_37 = arith.constant 5 : index
    %c0_38 = arith.constant 0 : index
    %c0_39 = arith.constant 0 : index
    %64 = vector.load %arg3[%c5_37, %c0_38, %c0_39] : memref<9x8x32xbf16, #tpu.memory_space<vmem>>, vector<1x8x32xbf16>
    %65 = vector.shape_cast %64 : vector<1x8x32xbf16> to vector<8x32xbf16>
    %66 = arith.extf %65 : vector<8x32xbf16> to vector<8x32xf32>
    %67 = arith.mulf %33, %66 : vector<8x32xf32>
    %cst_40 = arith.constant dense<0.000000e+00> : vector<8xf32>
    %68 = vector.multi_reduction <add>, %67, %cst_40 [1] : vector<8x32xf32> to vector<8xf32>
    %69 = vector.shape_cast %68 : vector<8xf32> to vector<8x1xf32>
    %c6_41 = arith.constant 6 : index
    %c0_42 = arith.constant 0 : index
    %c0_43 = arith.constant 0 : index
    %70 = vector.load %arg3[%c6_41, %c0_42, %c0_43] : memref<9x8x32xbf16, #tpu.memory_space<vmem>>, vector<1x8x32xbf16>
    %71 = vector.shape_cast %70 : vector<1x8x32xbf16> to vector<8x32xbf16>
    %72 = arith.extf %71 : vector<8x32xbf16> to vector<8x32xf32>
    %73 = arith.mulf %33, %72 : vector<8x32xf32>
    %cst_44 = arith.constant dense<0.000000e+00> : vector<8xf32>
    %74 = vector.multi_reduction <add>, %73, %cst_44 [1] : vector<8x32xf32> to vector<8xf32>
    %75 = vector.shape_cast %74 : vector<8xf32> to vector<8x1xf32>
    %c7_45 = arith.constant 7 : index
    %c0_46 = arith.constant 0 : index
    %c0_47 = arith.constant 0 : index
    %76 = vector.load %arg3[%c7_45, %c0_46, %c0_47] : memref<9x8x32xbf16, #tpu.memory_space<vmem>>, vector<1x8x32xbf16>
    %77 = vector.shape_cast %76 : vector<1x8x32xbf16> to vector<8x32xbf16>
    %78 = arith.extf %77 : vector<8x32xbf16> to vector<8x32xf32>
    %79 = arith.mulf %33, %78 : vector<8x32xf32>
    %cst_48 = arith.constant dense<0.000000e+00> : vector<8xf32>
    %80 = vector.multi_reduction <add>, %79, %cst_48 [1] : vector<8x32xf32> to vector<8xf32>
    %81 = vector.shape_cast %80 : vector<8xf32> to vector<8x1xf32>
    %c8 = arith.constant 8 : index
    %c0_49 = arith.constant 0 : index
    %c0_50 = arith.constant 0 : index
    %82 = vector.load %arg3[%c8, %c0_49, %c0_50] : memref<9x8x32xbf16, #tpu.memory_space<vmem>>, vector<1x8x32xbf16>
    %83 = vector.shape_cast %82 : vector<1x8x32xbf16> to vector<8x32xbf16>
    %84 = arith.extf %83 : vector<8x32xbf16> to vector<8x32xf32>
    %85 = arith.mulf %33, %84 : vector<8x32xf32>
    %cst_51 = arith.constant dense<0.000000e+00> : vector<8xf32>
    %86 = vector.multi_reduction <add>, %85, %cst_51 [1] : vector<8x32xf32> to vector<8xf32>
    %87 = vector.shape_cast %86 : vector<8xf32> to vector<8x1xf32>
    %88 = tpu.concatenate %39, %45, %51, %57, %63, %69, %75, %81, %87 in 1 : vector<8x1xf32>, vector<8x1xf32>, vector<8x1xf32>, vector<8x1xf32>, vector<8x1xf32>, vector<8x1xf32>, vector<8x1xf32>, vector<8x1xf32>, vector<8x1xf32> -> vector<8x9xf32>
    %c0_52 = arith.constant 0 : index
    %c0_53 = arith.constant 0 : index
    %89 = vector.load %arg4[%c0_52, %c0_53] : memref<8x9xf32, #tpu.memory_space<vmem>>, vector<8x9xf32>
    %90 = arith.addf %89, %88 : vector<8x9xf32>
    %c0_54 = arith.constant 0 : index
    %c0_55 = arith.constant 0 : index
    %91 = vector.load %arg5[%c0_54, %c0_55] : memref<8x9xf32, #tpu.memory_space<vmem>>, vector<8x9xf32>
    tpu.vector_store %arg5[%c0_54, %c0_55], %90 {strides = array<i32>} : memref<8x9xf32, #tpu.memory_space<vmem>>, vector<8x9xf32>,
    return
  }
  func.func @transform_0(%arg0: i32) -> (i32, i32, i32) {
    %c0_i32 = arith.constant 0 : i32
    %c0_i32_0 = arith.constant 0 : i32
    %c0_i32_1 = arith.constant 0 : i32
    return %c0_i32, %arg0, %c0_i32_0 : i32, i32, i32
  }
  func.func @transform_1(%arg0: i32) -> (i32, i32) {
    %c0_i32 = arith.constant 0 : i32
    %c0_i32_0 = arith.constant 0 : i32
    return %arg0, %c0_i32 : i32, i32
  }
  func.func @transform_2(%arg0: i32) -> (i32, i32, i32) {
    %c0_i32 = arith.constant 0 : i32
    %c0_i32_0 = arith.constant 0 : i32
    %c0_i32_1 = arith.constant 0 : i32
    return %c0_i32, %arg0, %c0_i32_0 : i32, i32, i32
  }
  func.func @transform_3(%arg0: i32) -> (i32, i32) {
    %c0_i32 = arith.constant 0 : i32
    %c0_i32_0 = arith.constant 0 : i32
    return %arg0, %c0_i32 : i32, i32
  }
  func.func @transform_4(%arg0: i32) -> (i32, i32) {
    %c0_i32 = arith.constant 0 : i32
    %c0_i32_0 = arith.constant 0 : i32
    return %arg0, %c0_i32 : i32, i32
  }
}

</mosaic_0001>

<bundles_post_ra>
// kernel: tpu_custom_call.1
= control target key start
LH: loop header
LB: loop body
LE: loop exit
PB: predicated region body
PF: predicated region fallthrough
CT: control target
= control target key end

     0   :  { %9 = vsyncpa [#allocation3], 0  ;;  %s419_s0 = inlined_call_operand.hbm [shape: bf16[8,8,32], index: 0, kind: input, shape index: {}]   ;;  %s420_s1 = inlined_call_operand.hbm [shape: bf16[8,32], index: 1, kind: input, shape index: {}]   ;;  %s421_s2 = inlined_call_operand.hbm [shape: bf16[9,8,32], index: 2, kind: input, shape index: {}]   ;;  %s422_s3 = inlined_call_operand.hbm [shape: f32[8,9], index: 3, kind: input, shape index: {}]   ;;  %s423_s4 = inlined_call_operand.hbm [shape: f32[8,9], index: 4, kind: output, shape index: {}]  }
   0x1   :  { %10 = vsyncpa [#allocation6], 0 }
   0x2   :  { %11 = vsyncpa [#allocation9], 0  ;;  %s31_s17 = sshll.u32 %s420_s1, 4  ;;  %s32_s17 = int_to_ptr.hbm [resolvable:$true] %s31_s17 }
   0x3   :  { %12 = vsyncpa [#allocation4], 0  ;;  %s363_s18 = smov [#allocation5]   ;;  %s17_s22 = sshll.u32 %s419_s0, 4  ;;  %s18_s22 = int_to_ptr.hbm [resolvable:$true] %s17_s22 }
   0x4   :  { %s33_s19 = sshll.u32 %s363_s18, 4  ;;  %s364_s23 = smov [#allocation2]   ;;  %s34_s19 = int_to_ptr.vmem [resolvable:$true] %s33_s19 }
   0x5   :  { %36 = dma.hbm_to_vmem [thread:$0]  %s32_s17, 64, %s34_s19, [#allocation6]  }
   0x6   :  { %s19_s24 = sshll.u32 %s364_s23, 4  ;;  %s365_s25 = smov 64   ;;  %s20_s24 = int_to_ptr.vmem [resolvable:$true] %s19_s24 }
   0x7   :  { %s366_s26 = smov 4   ;;  %s41_s1 = sshll.u32 %s421_s2, 4  ;;  %s42_s1 = int_to_ptr.hbm [resolvable:$true] %s41_s1 }
   0x8   :  { %25 = dma.hbm_to_vmem [thread:$0]  %s18_s22, 512, %s20_s24, [#allocation3], %s365_s25, %s365_s25, %s366_s26  }
   0x9   :  { %s367_s29 = smov [#allocation7]   ;;  %s55_s0 = sshll.u32 %s422_s3, 4  ;;  %s56_s0 = int_to_ptr.hbm [resolvable:$true] %s55_s0 }
   0xa   :  { %s43_s30 = sshll.u32 %s367_s29, 4  ;;  %s368_s7 = smov [#allocation8]   ;;  %s44_s30 = int_to_ptr.vmem [resolvable:$true] %s43_s30 }
   0xb   :  { %49 = dma.hbm_to_vmem [thread:$0]  %s42_s1, 576, %s44_s30, [#allocation6], %s365_s25, %s365_s25, %s366_s26  }
   0xc   :  { %s57_s8 = sshll.u32 %s368_s7, 4  ;;  %s58_s8 = int_to_ptr.vmem [resolvable:$true] %s57_s8 }
   0xd   :  { %60 = dma.hbm_to_vmem [thread:$0]  %s56_s0, 128, %s58_s8, [#allocation9]  }
   0xe   :  { %355 = dma.done.wait [#allocation3], 512  }
   0xf   :  { %356 = vsyncadd [#allocation3], 4294966784 }
  0x10   :  { %357 = dma.done.wait [#allocation6], 640  }
  0x11   :  { %358 = vsyncadd [#allocation6], 4294966656 }
  0x12   :  { %359 = dma.done.wait [#allocation9], 128  }
  0x13   :  { %360 = vsyncadd [#allocation9], 4294967168  ;;  %v213_v0 = vld [vmem:[#allocation2] sm:$0xff]   ;;  %v217_v1 = vld [vmem:[#allocation2 + $0x8] sm:$0xff]   ;;  %vm113_vm0 = vcmask 261120   ;;  %vm173_vm1 = vcmask 7168  }
  0x14   :  { %v221_v2 = vld [vmem:[#allocation2 + $0x10] sm:$0xff]   ;;  %v214_v3 = vunpack.c.l.bf16 %v213_v0  ;;  %v215_v4 = vunpack.c.h.bf16 %v213_v0  ;;  %v218_v5 = vunpack.c.l.bf16 %v217_v1  ;;  %v219_v6 = vunpack.c.h.bf16 %v217_v1  ;;  %v225_v7 = vld [vmem:[#allocation2 + $0x18] sm:$0xff]   ;;  %v107_v12 = vld [vmem:[#allocation5] sm:$0xf]  ;;  %s369_s2 = smov [#allocation10]   ;;  %s200_s11 = sshll.u32 %s423_s4, 4  ;;  %s201_s11 = int_to_ptr.hbm [resolvable:$true] %s200_s11 }
  0x15   :  { %v222_v8 = vunpack.c.l.bf16 %v221_v2  ;;  %v223_v9 = vunpack.c.h.bf16 %v221_v2  ;;  %v226_v10 = vunpack.c.l.bf16 %v225_v7  ;;  %v227_v11 = vunpack.c.h.bf16 %v225_v7  ;;  %v110_v17 = vld [vmem:[#allocation7] sm:$0xff]   ;;  %v125_v18 = vld [vmem:[#allocation7 + $0x8] sm:$0xff]   ;;  %v139_v19 = vld [vmem:[#allocation7 + $0x10] sm:$0xff]   ;;  %s198_s3 = sshll.u32 %s369_s2, 4  ;;  %s199_s3 = int_to_ptr.vmem [resolvable:$true] %s198_s3 }
  0x16   :  { %v108_v22 = vunpack.c.l.bf16 %v107_v12  ;;  %v111_v24 = vunpack.c.l.bf16 %v110_v17  ;;  %v126_v25 = vunpack.c.l.bf16 %v125_v18  ;;  %v140_v26 = vunpack.c.l.bf16 %v139_v19  ;;  %v153_v40 = vld [vmem:[#allocation7 + $0x18] sm:$0xff]   ;;  %v167_v41 = vld [vmem:[#allocation7 + $0x20] sm:$0xf] }
  0x17   :  { %v91_v13 = vadd.f32 %v222_v8, %v214_v3  ;;  %v95_v14 = vadd.f32 %v223_v9, %v215_v4  ;;  %v99_v15 = vadd.f32 %v226_v10, %v218_v5  ;;  %v103_v16 = vadd.f32 %v227_v11, %v219_v6  ;;  %v189_v4 = vld [vmem:[#allocation8] sm:$0xff] }
  0x18   :  { %v119_v28 = vunpack.c.h.bf16 %v110_v17  ;;  %v133_v32 = vunpack.c.h.bf16 %v125_v18  ;;  %v147_v33 = vunpack.c.h.bf16 %v139_v19  ;;  %v154_v44 = vunpack.c.l.bf16 %v153_v40 }
  0x19   :  { %v104_v20 = vadd.f32 %v95_v14, %v91_v13  ;;  %v105_v21 = vadd.f32 %v103_v16, %v99_v15  ;;  %v161_v45 = vunpack.c.h.bf16 %v153_v40  ;;  %v168_v47 = vunpack.c.l.bf16 %v167_v41 }
  0x1a   :  { %vm175_vm2 = vcmask 15360   ;;  %vm177_vm3 = vcmask 23552   ;;  %vm179_vm4 = vcmask 31744   ;;  %vm181_vm5 = vcmask 39936  }
  0x1b   :  { %v106_v23 = vadd.f32 %v105_v21, %v104_v20  ;;  %vm183_vm6 = vcmask 48128   ;;  %vm185_vm7 = vcmask 56320   ;;  %vm187_vm8 = vcmask 64512  }
  0x1c   :  { %vm191_vm9 = vcmask 72704  }
  0x1d   :  { %v109_v27 = vsub.f32 %v106_v23, %v108_v22 }
  0x1f   :  { %v112_v29 = vmul.f32 %v111_v24, %v109_v27  ;;  %v127_v30 = vmul.f32 %v126_v25, %v109_v27  ;;  %v141_v31 = vmul.f32 %v140_v26, %v109_v27  ;;  %v120_v37 = vmul.f32 %v119_v28, %v109_v27 }
  0x20   :  { %v134_v38 = vmul.f32 %v133_v32, %v109_v27  ;;  %v148_v39 = vmul.f32 %v147_v33, %v109_v27  ;;  %v155_v48 = vmul.f32 %v154_v44, %v109_v27  ;;  %v162_v49 = vmul.f32 %v161_v45, %v109_v27 }
  0x21   :  { %v114_v34 = vsel %vm113_vm0, %v112_v29, 0.0  ;;  %v128_v35 = vsel %vm113_vm0, %v127_v30, 0.0  ;;  %v142_v36 = vsel %vm113_vm0, %v141_v31, 0.0  ;;  %v121_v42 = vsel %vm113_vm0, %v120_v37, 0.0 }
  0x22   :  { %115 = vadd.xlane.f32.xlu0 %v114_v34  ;;  %129 = vadd.xlane.f32.xlu1 %v128_v35  ;;  %v135_v43 = vsel %vm113_vm0, %v134_v38, 0.0  ;;  %v149_v46 = vsel %vm113_vm0, %v148_v39, 0.0  ;;  %v169_v50 = vmul.f32 %v168_v47, %v109_v27  ;;  %v156_v51 = vsel %vm113_vm0, %v155_v48, 0.0 }
  0x23   :  { %143 = vadd.xlane.f32.xlu2 %v142_v36  ;;  %v163_v52 = vsel %vm113_vm0, %v162_v49, 0.0 }
  0x24   :  { %v170_v53 = vsel %vm113_vm0, %v169_v50, 0.0 }
  0x2a   :  { %122 = vadd.xlane.f32.xlu0 %v121_v42  ;;  %136 = vadd.xlane.f32.xlu1 %v135_v43 }
  0x2b   :  { %150 = vadd.xlane.f32.xlu2 %v149_v46 }
  0x32   :  { %157 = vadd.xlane.f32.xlu0 %v156_v51  ;;  %164 = vadd.xlane.f32.xlu1 %v163_v52 }
  0x33   :  { %171 = vadd.xlane.f32.xlu2 %v170_v53 }
  0x95   :  { %v116_v54 = vpop.xlane.xlu0 %115  ;;  %v130_v55 = vpop.xlane.xlu1 %129 }
  0x96   :  { %v144_v56 = vpop.xlane.xlu2 %143 }
  0x9d   :  { %v123_v57 = vpop.xlane.xlu0 %122  ;;  %v137_v58 = vpop.xlane.xlu1 %136 }
  0x9e   :  { %v174_v59 = vsel %vm173_vm1, %v116_v54, %v123_v57  ;;  %v151_v60 = vpop.xlane.xlu2 %150 }
  0x9f   :  { %v176_v61 = vsel %vm175_vm2, %v174_v59, %v130_v55 }
  0xa0   :  { %v178_v62 = vsel %vm177_vm3, %v176_v61, %v137_v58 }
  0xa1   :  { %v180_v63 = vsel %vm179_vm4, %v178_v62, %v144_v56 }
  0xa2   :  { %v182_v0 = vsel %vm181_vm5, %v180_v63, %v151_v60 }
  0xa5   :  { %v158_v1 = vpop.xlane.xlu0 %157  ;;  %v165_v2 = vpop.xlane.xlu1 %164 }
  0xa6   :  { %v184_v3 = vsel %vm183_vm6, %v182_v0, %v158_v1  ;;  %v172_v5 = vpop.xlane.xlu2 %171 }
  0xa7   :  { %v186_v6 = vsel %vm185_vm7, %v184_v3, %v165_v2 }
  0xa8   :  { %v188_v7 = vsel %vm187_vm8, %v186_v6, %v172_v5 }
  0xa9   :  { %v190_v8 = vadd.f32 %v189_v4, %v188_v7 }
  0xab   :  { %192 = vst.msk [vmem:[#allocation10] sm:$0xff] %vm191_vm9, %v190_v8 }
  0xac   :  { %203 = dma.vmem_to_hbm [thread:$0]  %s199_s3, 128, %s201_s11, [#allocation4]  }
  0xad   :  { %361 = dma.done.wait [#allocation4], 128  }
  0xae   :  { %362 = vsyncadd [#allocation4], 4294967168 }
  0xaf   :  { %208 = vsyncpa [#allocation3], 1 }
  0xb0   :  { %209 = vsyncpa [#allocation6], 1 }
  0xb1   :  { %210 = vsyncpa [#allocation9], 1 }
  0xb2   :  { %211 = vsyncpa [#allocation4], 1 }

</bundles_post_ra>
